<compile_context>
chip_gen: v5e
topology: v5e:2x2
jax: 0.10.0
libtpu: 0.0.40
codegen_flags: <defaults>
</compile_context>

<pallas_src>
import functools

import jax
import jax.numpy as jnp
from jax.experimental import pallas as pl
from jax.experimental.pallas import tpu as pltpu


LANE = 128


def _round_up(v, m):
    return ((v + m - 1) // m) * m


# --------------------------------------------------------------------------- #
# Kernel 0: feature transform  support = x @ W   (row-tiled, W resident)       #
# --------------------------------------------------------------------------- #
def feature_kernel(x_ref, w_ref, out_ref):
    out_ref[...] = jnp.dot(
        x_ref[...], w_ref[...], preferred_element_type=jnp.float32
    ).astype(out_ref.dtype)


# --------------------------------------------------------------------------- #
# Kernel 1: quantize adj tile (act_alq) + adj_q @ support + scale/bias/relu    #
#           also emits the bf16 adj_q for reuse in layer 2                     #
# --------------------------------------------------------------------------- #
def layer1_kernel(params_ref, adj_ref, s_ref, b_ref, adjq_ref, h_ref, acc_ref,
                  *, levels):
    k = pl.program_id(1)

    @pl.when(k == 0)
    def _():
        acc_ref[...] = jnp.zeros_like(acc_ref)

    # --- activation quantization of this adjacency tile (act_alq) ---
    inv = params_ref[0]                                   # levels / alpha
    adj_q = jnp.round(jnp.clip(adj_ref[...] * inv, 0.0, levels))
    adjq_ref[...] = adj_q.astype(adjq_ref.dtype)          # bf16 store, exact on integer grid

    # --- accumulate adj_q[k-block] @ support[k-block] on the MXU ---
    acc_ref[...] += jnp.dot(adj_q, s_ref[...], preferred_element_type=jnp.float32)

    # --- finalize once per row tile: scale, bias, relu (dropout = identity) ---
    @pl.when(k == pl.num_programs(1) - 1)
    def _():
        scale = params_ref[1]                             # alpha / levels
        h = acc_ref[...] * scale + b_ref[...]
        h_ref[...] = jnp.maximum(h, 0.0).astype(h_ref.dtype)


# --------------------------------------------------------------------------- #
# Kernel 2: adj_q @ support2 (bf16 adj_q) + scale/bias + masked softmax        #
# --------------------------------------------------------------------------- #
def layer2_kernel(params_ref, adjq_ref, s_ref, b_ref, out_ref, acc_ref, *, nclass):
    k = pl.program_id(1)

    @pl.when(k == 0)
    def _():
        acc_ref[...] = jnp.zeros_like(acc_ref)

    adj_q = adjq_ref[...].astype(jnp.float32)             # exact upcast
    acc_ref[...] += jnp.dot(adj_q, s_ref[...], preferred_element_type=jnp.float32)

    @pl.when(k == pl.num_programs(1) - 1)
    def _():
        scale = params_ref[1]
        o = acc_ref[...] * scale + b_ref[...]
        # mask lane-padding columns out of the softmax
        col = jax.lax.broadcasted_iota(jnp.int32, o.shape, 1)
        o = jnp.where(col < nclass, o, jnp.float32(-1e30))
        m = jnp.max(o, axis=1, keepdims=True)
        e = jnp.exp(o - m)
        denom = jnp.sum(e, axis=1, keepdims=True)
        out_ref[...] = (e * pl.reciprocal(denom, approx=True)).astype(out_ref.dtype)


# --------------------------------------------------------------------------- #
# Wrapper                                                                      #
# --------------------------------------------------------------------------- #
def _feature_transform(x_p, w_p, bm, vmem_bytes):
    n_p, f = x_p.shape
    d = w_p.shape[1]
    return pl.pallas_call(
        feature_kernel,
        out_shape=jax.ShapeDtypeStruct((n_p, d), jnp.float32),
        grid_spec=pltpu.PrefetchScalarGridSpec(
            num_scalar_prefetch=0,
            grid=(n_p // bm,),
            in_specs=[
                pl.BlockSpec((bm, f), lambda i: (i, 0)),
                pl.BlockSpec((f, d), lambda i: (0, 0)),
            ],
            out_specs=pl.BlockSpec((bm, d), lambda i: (i, 0)),
        ),
        compiler_params=pltpu.CompilerParams(
            dimension_semantics=("parallel",),
            vmem_limit_bytes=vmem_bytes,
        ),
    )(x_p, w_p)


def qgcn_forward(x, adj, w1, b1, w2, b2, act_alpha, *, nbits, block=256):
    n, nfeat = x.shape
    nhid = w1.shape[1]
    nclass = w2.shape[1]

    levels = float(2 ** nbits - 1)
    adjq_dtype = jnp.bfloat16 if levels <= 255 else jnp.float32

    # lane-dense padding for hidden / class channels, row padding to the tile
    nhid_p = _round_up(max(nhid, LANE), LANE)
    nclass_p = _round_up(max(nclass, LANE), LANE)
    bm = bk = block
    n_p = _round_up(n, block)

    f32 = jnp.float32
    adj_p = jnp.pad(adj.astype(f32), ((0, n_p - n), (0, n_p - n)))
    x_p = jnp.pad(x.astype(f32), ((0, n_p - n), (0, 0)))
    w1_p = jnp.pad(w1.astype(f32), ((0, 0), (0, nhid_p - nhid)))
    b1_p = jnp.pad(b1.astype(f32), (0, nhid_p - nhid)).reshape(1, nhid_p)
    w2_p = jnp.pad(w2.astype(f32), ((0, nhid_p - nhid), (0, nclass_p - nclass)))
    b2_p = jnp.pad(b2.astype(f32), (0, nclass_p - nclass)).reshape(1, nclass_p)

    alpha = jnp.asarray(act_alpha, f32)
    # [levels/alpha, alpha/levels], kept in SMEM so alpha stays a runtime value.
    params = jnp.stack([levels / alpha, alpha / levels]).astype(f32)

    grid = (n_p // bm, n_p // bk)
    vmem_bytes = 32 * 1024 * 1024
    cparams = pltpu.CompilerParams(
        dimension_semantics=("parallel", "arbitrary"),
        vmem_limit_bytes=vmem_bytes,
    )
    smem_spec = pl.BlockSpec(memory_space=pltpu.MemorySpace.SMEM)

    # ---- support1 = x @ W1 (computed once, not per adjacency row tile) ----
    support1 = _feature_transform(x_p, w1_p, bm, vmem_bytes)

    # ---- layer 1: quantize adj + adj_q @ support1 + scale/bias/relu ----
    adj_q, h = pl.pallas_call(
        functools.partial(layer1_kernel, levels=levels),
        out_shape=(
            jax.ShapeDtypeStruct((n_p, n_p), adjq_dtype),
            jax.ShapeDtypeStruct((n_p, nhid_p), f32),
        ),
        grid_spec=pltpu.PrefetchScalarGridSpec(
            num_scalar_prefetch=0,
            grid=grid,
            in_specs=[
                smem_spec,                                           # [inv, scale]
                pl.BlockSpec((bm, bk), lambda i, k: (i, k)),         # adj tile
                pl.BlockSpec((bk, nhid_p), lambda i, k: (k, 0)),     # support1 rows
                pl.BlockSpec((1, nhid_p), lambda i, k: (0, 0)),      # b1
            ],
            out_specs=(
                pl.BlockSpec((bm, bk), lambda i, k: (i, k)),         # adj_q tile
                pl.BlockSpec((bm, nhid_p), lambda i, k: (i, 0)),     # h row tile
            ),
            scratch_shapes=[pltpu.VMEM((bm, nhid_p), f32)],
        ),
        compiler_params=cparams,
    )(params, adj_p, support1, b1_p)

    # ---- support2 = h @ W2 ----
    support2 = _feature_transform(h, w2_p, bm, vmem_bytes)

    # ---- layer 2: adj_q @ support2 + scale/bias + softmax ----
    out_p = pl.pallas_call(
        functools.partial(layer2_kernel, nclass=nclass),
        out_shape=jax.ShapeDtypeStruct((n_p, nclass_p), f32),
        grid_spec=pltpu.PrefetchScalarGridSpec(
            num_scalar_prefetch=0,
            grid=grid,
            in_specs=[
                smem_spec,                                           # [inv, scale]
                pl.BlockSpec((bm, bk), lambda i, k: (i, k)),         # adj_q tile (bf16)
                pl.BlockSpec((bk, nclass_p), lambda i, k: (k, 0)),   # support2 rows
                pl.BlockSpec((1, nclass_p), lambda i, k: (0, 0)),    # b2
            ],
            out_specs=pl.BlockSpec((bm, nclass_p), lambda i, k: (i, 0)),
            scratch_shapes=[pltpu.VMEM((bm, nclass_p), f32)],
        ),
        compiler_params=cparams,
    )(params, adj_q, support2, b2_p)

    return out_p[:n, :nclass]


# --------------------------------------------------------------------------- #
# Pure-JAX reference (same semantics) for validation                           #
# --------------------------------------------------------------------------- #
def qgcn_reference(x, adj, w1, b1, w2, b2, alpha, nbits):
    levels = 2.0 ** nbits - 1.0
    adj_q = jnp.round(jnp.clip(adj / alpha, 0.0, 1.0) * levels)
    scale = alpha / levels
    h = jnp.maximum(adj_q @ (x @ w1) * scale + b1, 0.0)
    o = adj_q @ (h @ w2) * scale + b2
    return jax.nn.softmax(o, axis=1)


if __name__ == "__main__":
    # Small shapes consistent with the module (n nodes, nfeat features).
    n_nodes, nfeat, nhid, nclass = 300, 32, 32, 8
    nbits = 4
    dropout = 0.5  # unused at inference

    key = jax.random.PRNGKey(0)
    kx, kadj, kw1, kb1, kw2, kb2 = jax.random.split(key, 6)

    x = jax.random.normal(kx, (n_nodes, nfeat), jnp.float32)
    # Non-negative "normalized adjacency"-like matrix in [0, 1).
    adj = jax.random.uniform(kadj, (n_nodes, n_nodes), jnp.float32)

    # GraphConvolution init: uniform(-stdv, stdv), stdv = 1/sqrt(out_features).
    stdv1 = 1.0 / jnp.sqrt(jnp.float32(nhid))
    w1 = jax.random.uniform(kw1, (nfeat, nhid), jnp.float32, -stdv1, stdv1)
    b1 = jax.random.uniform(kb1, (nhid,), jnp.float32, -stdv1, stdv1)
    stdv2 = 1.0 / jnp.sqrt(jnp.float32(nclass))
    w2 = jax.random.uniform(kw2, (nhid, nclass), jnp.float32, -stdv2, stdv2)
    b2 = jax.random.uniform(kb2, (nclass,), jnp.float32, -stdv2, stdv2)

    act_alpha = 1.0  # torch.nn.Parameter(torch.tensor(1.0))

    out = qgcn_forward(x, adj, w1, b1, w2, b2, act_alpha, nbits=nbits)
    out = jax.block_until_ready(out)

    assert out.shape == (n_nodes, nclass)
    # softmax rows sum to 1 (loose tolerance: approx reciprocal in the epilogue)
    assert jnp.allclose(jnp.sum(out, axis=1), 1.0, atol=2e-2)

    ref = qgcn_reference(x, adj, w1, b1, w2, b2, jnp.float32(act_alpha), nbits)
    assert jnp.allclose(out, ref, atol=2e-2), float(jnp.max(jnp.abs(out - ref)))

    print("KERNEL_OK")
</pallas_src>

<mosaic_0001>
module attributes {stable_mosaic.version = 11 : i64} {
  func.func @feature_kernel(%arg0: i32, %arg1: memref<256x32xf32, #tpu.memory_space<vmem>>, %arg2: memref<32x128xf32, #tpu.memory_space<vmem>>, %arg3: memref<256x128xf32, #tpu.memory_space<vmem>>) attributes {dimension_semantics = [#tpu.dimension_semantics<parallel>], iteration_bounds = array<i64: 2>, scalar_prefetch = 0 : i64, scratch_operands = 0 : i64, tpu.core_type = #tpu.core_type<tc>, window_params = [{transform_indices = @transform_0, window_bounds = array<i64: 256, 32>}, {pipeline_mode = #tpu.pipeline_mode<synchronous>, transform_indices = @transform_1, window_bounds = array<i64: 32, 128>}, {transform_indices = @transform_2, window_bounds = array<i64: 256, 128>}]} {
    %c0 = arith.constant 0 : index
    %c0_0 = arith.constant 0 : index
    %0 = vector.load %arg1[%c0, %c0_0] : memref<256x32xf32, #tpu.memory_space<vmem>>, vector<256x32xf32>
    %c0_1 = arith.constant 0 : index
    %c0_2 = arith.constant 0 : index
    %1 = vector.load %arg2[%c0_1, %c0_2] : memref<32x128xf32, #tpu.memory_space<vmem>>, vector<32x128xf32>
    %cst = arith.constant dense<0.000000e+00> : vector<256x128xf32>
    %2 = tpu.matmul %0, %1, %cst {dimension_numbers = #tpu.dot_dimension_numbers<[1], [0], [0], [1], [0, 0, 1, 1], [], []>} : vector<256x32xf32>, vector<32x128xf32>, vector<256x128xf32> -> vector<256x128xf32>
    %c0_3 = arith.constant 0 : index
    %c0_4 = arith.constant 0 : index
    %3 = vector.load %arg3[%c0_3, %c0_4] : memref<256x128xf32, #tpu.memory_space<vmem>>, vector<256x128xf32>
    tpu.vector_store %arg3[%c0_3, %c0_4], %2 {strides = array<i32>} : memref<256x128xf32, #tpu.memory_space<vmem>>, vector<256x128xf32>,
    return
  }
  func.func @transform_0(%arg0: i32) -> (i32, i32) {
    %c0_i32 = arith.constant 0 : i32
    %c0_i32_0 = arith.constant 0 : i32
    return %arg0, %c0_i32 : i32, i32
  }
  func.func @transform_1(%arg0: i32) -> (i32, i32) {
    %c0_i32 = arith.constant 0 : i32
    %c0_i32_0 = arith.constant 0 : i32
    %c0_i32_1 = arith.constant 0 : i32
    return %c0_i32, %c0_i32_0 : i32, i32
  }
  func.func @transform_2(%arg0: i32) -> (i32, i32) {
    %c0_i32 = arith.constant 0 : i32
    %c0_i32_0 = arith.constant 0 : i32
    return %arg0, %c0_i32 : i32, i32
  }
}

</mosaic_0001>

<bundles_post_ra>
// kernel: tpu_custom_call.1
= control target key start
LH: loop header
LB: loop body
LE: loop exit
PB: predicated region body
PF: predicated region fallthrough
CT: control target
= control target key end

     0   :  { %7 = vsyncpa [#allocation3], 0  ;;  %s881_s0 = inlined_call_operand.vmem [shape: f32[512,32], index: 0, kind: input, shape index: {}]   ;;  %s882_s1 = inlined_call_operand.vmem [shape: f32[32,128], index: 1, kind: input, shape index: {}]   ;;  %s883_s2 = inlined_call_operand.hbm [shape: f32[512,128], index: 2, kind: output, shape index: {}]  }
   0x1   :  { %9 = vsyncpa [#allocation3 + $0x1], 0  ;;  %s680_s9 = smov 0   ;;  %s682_s10 = smov 0  }
   0x2   :  { %s684_s11 = smov 0   ;;  %s686_s12 = smov 0  }
   0x3 LB: > { %s701_s13 = sadd.s32 4294967295, %s661_s12   ;;  %s501_s14 = sadd.s32 4294967294, %s661_s12   ;;  %s661_s12 = sphi %s686_s12, %s889_s12   ;;  %s657_s11 = sphi %s684_s11, %s888_s11   ;;  %s653_s10 = sphi %s682_s10, %s887_s10   ;;  %s649_s9 = sphi %s680_s9, %s886_s9  }
   0x4   : > { %s705_s15 = sadd.s32 1, %s661_s12   ;;  %s69_s16 = sadd.s32 1, %s657_s11 }
   0x5   : > { %s66_s17 = ssub.s32 %s661_s12, %s705_s15  ;;  %p79_p0 = scmp.ne.s32.totalorder %s657_s11, %s653_s10 }
   0x6   : > { %p67_p1 = scmp.eq.s32.totalorder %s66_s17, 0  ;;  %p80_p2 = scmp.eq.s32.totalorder %s701_s13, 1 }
   0x7   : > { %p85_p3 = scmp.ne.s32.totalorder %s653_s10, %s649_s9  ;;  %p86_p4 = scmp.eq.s32.totalorder %s501_s14, 1 }
   0x8   : > { %s716_s18 = scalar_select %p67_p1, %s657_s11, %s69_s16  }
   0x9   : > { %p718_p5 = por %p80_p2, %p79_p0  ;;  %p722_p6 = por %p86_p4, %p85_p3 }
   0xa   : > { %p504_p7 = scmp.ge.s32.totalorder %s661_s12, 1  ;;  %p116_p8 = scmp.lt.s32.totalorder %s661_s12, 3 }
   0xc   : > { %p117_p9 = pnand %p504_p7, %p116_p8 }
   0xd   : > { %s506_s25 = sshll.u32 (!%p117_p9), %s701_s13, 5  ;;  %s135_s6 = sand.u32 (!%p117_p9), 1, %s653_s10  }
   0xe   : > { %120 = sbr.rel (%p117_p9) target bundleno = 220 (0xdc), region = 28  ;;  %p139_p10 = scmp.lt.s32.totalorder (!%p117_p9), %s506_s25, 63 }
   0xf   : > { %s505_s7 = sshll.u32 (!%p117_p9), %s135_s6, 8  ;;  %s545_s14 = sshll.u32 (!%p117_p9), %s701_s13, 8 }
  0x10   : > { %s813_s8 = scalar_lea.vmem (!%p117_p9), [#allocation2], %s505_s7  ;;  %s435_s21 = scalar_lea.hbm (!%p117_p9), %s883_s2, %s545_s14 }
  0x11   : > { %s436_s22 = sshll.u32 (!%p117_p9), %s813_s8, 4  ;;  %s438_s23 = sshll.u32 (!%p117_p9), %s435_s21, 4  ;;  %s437_s22 = int_to_ptr.vmem [resolvable:$true] %s436_s22  ;;  %s439_s23 = int_to_ptr.hbm [resolvable:$true] %s438_s23 }
  0x12   : > { %s424_s13 = scalar_lea.sflag (!%p117_p9), [#allocation3], %s135_s6  ;;  %s613_s24 = sshra.s32 (!%p117_p9), %s439_s23, 4  ;;  %s614_s24 = int_to_ptr.hbm [resolvable:$true] %s613_s24 }
  0x13   : > { %v180_v0 = vld [vmem:[%s882_s1 + $0x18] sm:$0xff]  ;;  %v179_v1 = vld [vmem:[%s882_s1 + $0x10] sm:$0xff]  ;;  %v178_v2 = vld [vmem:[%s882_s1 + $0x8] sm:$0xff]  ;;  %s891_s25 = smov (!%p139_p10, %s506_s25), 63  ;;  %vm181_vm0 = vcmask 261120   ;;  %s619_s28 = scalar_lea.hbm %s883_s2, 512 }
  0x14   : > { %547 = vmatpush.msra.mxu2 %v180_v0  ;;  %548 = vmatpush.msra.mxu3 %v180_v0  ;;  %v177_v3 = vld [vmem:[%s882_s1] sm:$0xff]  ;;  %s507_s30 = sshll.u32 %s891_s25, 3  ;;  %s615_s25 = scalar_lea.hbm %s614_s24, 256 }
  0x15   : > { %290 = vmatpush.msra.mxu0 %v180_v0  ;;  %546 = vmatpush.msra.mxu1 %v180_v0  ;;  %s744_s5 = scalar_lea.vmem %s881_s0, %s507_s30  ;;  %p616_p11 = scmp.ne.s32.totalorder %s614_s24, %s615_s25 }
  0x16   : > { %550 = vmatpush.msra.mxu2 %v179_v1  ;;  %551 = vmatpush.msra.mxu3 %v179_v1  ;;  %v161_v4 = vld [vmem:[%s744_s5 + $0x80] sm:$0xff]  ;;  %v162_v8 = vld [vmem:[%s744_s5 + $0x88] sm:$0xff]  ;;  %v163_v12 = vld [vmem:[%s744_s5 + $0x90] sm:$0xff]  ;;  %p620_p0 = scmp.lt.s32.totalorder %s614_s24, %s883_s2  ;;  %p621_p1 = scmp.lt.s32.totalorder %s619_s28, %s615_s25 }
  0x17   : > { %291 = vmatpush.msra.mxu0 %v179_v1  ;;  %549 = vmatpush.msra.mxu1 %v179_v1  ;;  %v169_v5 = vld [vmem:[%s744_s5 + $0xc0] sm:$0xff]  ;;  %v170_v9 = vld [vmem:[%s744_s5 + $0xc8] sm:$0xff]  ;;  %v171_v13 = vld [vmem:[%s744_s5 + $0xd0] sm:$0xff]  ;;  %p617_p12 = pnand %p616_p11, %p718_p5 }
  0x18   : > { %553 = vmatpush.msra.mxu2 %v178_v2  ;;  %554 = vmatpush.msra.mxu3 %v178_v2  ;;  %v145_v6 = vld [vmem:[%s744_s5] sm:$0xff]  ;;  %v146_v10 = vld [vmem:[%s744_s5 + $0x8] sm:$0xff]  ;;  %v147_v14 = vld [vmem:[%s744_s5 + $0x10] sm:$0xff]  ;;  %p622_p2 = por %p621_p1, %p620_p0 }
  0x19   : > { %292 = vmatpush.msra.mxu0 %v178_v2  ;;  %552 = vmatpush.msra.mxu1 %v178_v2  ;;  %v153_v7 = vld [vmem:[%s744_s5 + $0x40] sm:$0xff]  ;;  %v154_v11 = vld [vmem:[%s744_s5 + $0x48] sm:$0xff]  ;;  %v155_v15 = vld [vmem:[%s744_s5 + $0x50] sm:$0xff]  ;;  %p618_p13 = pneg %p617_p12 }
  0x1a   : > { %556 = vmatpush.msra.mxu2 %v177_v3  ;;  %557 = vmatpush.msra.mxu3 %v177_v3  ;;  %v164_v16 = vld [vmem:[%s744_s5 + $0x98] sm:$0xff]  ;;  %v165_v20 = vld [vmem:[%s744_s5 + $0xa0] sm:$0xff]  ;;  %v166_v24 = vld [vmem:[%s744_s5 + $0xa8] sm:$0xff] }
  0x1b   : > { %524 = vmatmul.msk.f32.vlgmr.msra.gmra.mxu2 %vm181_vm0, %v161_v4  ;;  %532 = vmatmul.msk.f32.vlgmr.msra.gmra.mxu3 %vm181_vm0, %v169_v5  ;;  %v172_v17 = vld [vmem:[%s744_s5 + $0xd8] sm:$0xff]  ;;  %v173_v21 = vld [vmem:[%s744_s5 + $0xe0] sm:$0xff]  ;;  %v174_v25 = vld [vmem:[%s744_s5 + $0xe8] sm:$0xff]  ;;  %p623_p3 = pnand %p622_p2, %p618_p13 }
  0x1c   : > { %293 = vmatpush.msra.mxu0 %v177_v3  ;;  %555 = vmatpush.msra.mxu1 %v177_v3  ;;  %v148_v18 = vld [vmem:[%s744_s5 + $0x18] sm:$0xff]  ;;  %v149_v22 = vld [vmem:[%s744_s5 + $0x20] sm:$0xff]  ;;  %v150_v26 = vld [vmem:[%s744_s5 + $0x28] sm:$0xff] }
  0x1d   : > { %508 = vmatmul.msk.f32.vlgmr.msra.gmra.mxu0 %vm181_vm0, %v145_v6  ;;  %516 = vmatmul.msk.f32.vlgmr.msra.gmra.mxu1 %vm181_vm0, %v153_v7  ;;  %v156_v19 = vld [vmem:[%s744_s5 + $0x58] sm:$0xff]  ;;  %v157_v23 = vld [vmem:[%s744_s5 + $0x60] sm:$0xff]  ;;  %v158_v27 = vld [vmem:[%s744_s5 + $0x68] sm:$0xff] }
  0x1e   : > { %v167_v28 = vld [vmem:[%s744_s5 + $0xb0] sm:$0xff]  ;;  %v168_v32 = vld [vmem:[%s744_s5 + $0xb8] sm:$0xff] }
  0x1f   : > { %v175_v29 = vld [vmem:[%s744_s5 + $0xf0] sm:$0xff]  ;;  %v176_v33 = vld [vmem:[%s744_s5 + $0xf8] sm:$0xff] }
  0x20   : > { %v151_v30 = vld [vmem:[%s744_s5 + $0x30] sm:$0xff]  ;;  %v152_v34 = vld [vmem:[%s744_s5 + $0x38] sm:$0xff] }
  0x21   : > { %v159_v31 = vld [vmem:[%s744_s5 + $0x70] sm:$0xff]  ;;  %v160_v35 = vld [vmem:[%s744_s5 + $0x78] sm:$0xff] }
  0x23   : > { %525 = vmatmul.msk.f32.gmra.mxu2 %vm181_vm0, %v162_v8  ;;  %533 = vmatmul.msk.f32.gmra.mxu3 %vm181_vm0, %v170_v9 }
  0x25   : > { %509 = vmatmul.msk.f32.gmra.mxu0 %vm181_vm0, %v146_v10  ;;  %517 = vmatmul.msk.f32.gmra.mxu1 %vm181_vm0, %v154_v11 }
  0x2b   : > { %526 = vmatmul.msk.f32.gmra.mxu2 %vm181_vm0, %v163_v12  ;;  %534 = vmatmul.msk.f32.gmra.mxu3 %vm181_vm0, %v171_v13 }
  0x2d   : > { %510 = vmatmul.msk.f32.gmra.mxu0 %vm181_vm0, %v147_v14  ;;  %518 = vmatmul.msk.f32.gmra.mxu1 %vm181_vm0, %v155_v15 }
  0x33   : > { %527 = vmatmul.msk.f32.gmra.mxu2 %vm181_vm0, %v164_v16  ;;  %535 = vmatmul.msk.f32.gmra.mxu3 %vm181_vm0, %v172_v17 }
  0x35   : > { %511 = vmatmul.msk.f32.gmra.mxu0 %vm181_vm0, %v148_v18  ;;  %519 = vmatmul.msk.f32.gmra.mxu1 %vm181_vm0, %v156_v19 }
  0x3b   : > { %528 = vmatmul.msk.f32.gmra.mxu2 %vm181_vm0, %v165_v20  ;;  %536 = vmatmul.msk.f32.gmra.mxu3 %vm181_vm0, %v173_v21 }
  0x3d   : > { %512 = vmatmul.msk.f32.gmra.mxu0 %vm181_vm0, %v149_v22  ;;  %520 = vmatmul.msk.f32.gmra.mxu1 %vm181_vm0, %v157_v23 }
  0x43   : > { %529 = vmatmul.msk.f32.gmra.mxu2 %vm181_vm0, %v166_v24  ;;  %537 = vmatmul.msk.f32.gmra.mxu3 %vm181_vm0, %v174_v25 }
  0x45   : > { %513 = vmatmul.msk.f32.gmra.mxu0 %vm181_vm0, %v150_v26  ;;  %521 = vmatmul.msk.f32.gmra.mxu1 %vm181_vm0, %v158_v27 }
  0x4b   : > { %530 = vmatmul.msk.f32.gmra.mxu2 %vm181_vm0, %v167_v28  ;;  %538 = vmatmul.msk.f32.gmra.mxu3 %vm181_vm0, %v175_v29 }
  0x4d   : > { %514 = vmatmul.msk.f32.gmra.mxu0 %vm181_vm0, %v151_v30  ;;  %522 = vmatmul.msk.f32.gmra.mxu1 %vm181_vm0, %v159_v31 }
  0x53   : > { %531 = vmatmul.msk.f32.gmra.mxu2 %vm181_vm0, %v168_v32  ;;  %539 = vmatmul.msk.f32.gmra.mxu3 %vm181_vm0, %v176_v33 }
  0x55   : > { %515 = vmatmul.msk.f32.gmra.mxu0 %vm181_vm0, %v152_v34  ;;  %523 = vmatmul.msk.f32.gmra.mxu1 %vm181_vm0, %v160_v35 }
  0x9a   : > { %v295_v36 = vpop.f32.mrf.mxu0  ;;  %v319_v37 = vpop.f32.mrf.mxu1 }
  0x9b   : > { %391 = vst [vmem:[%s813_s8] sm:$0xff] %v295_v36 }
  0x9c   : > { %399 = vst [vmem:[%s813_s8 + $0x40] sm:$0xff] %v319_v37 }
  0x9e   : > { %v343_v38 = vpop.f32.mrf.mxu2  ;;  %v367_v39 = vpop.f32.mrf.mxu3 }
  0x9f   : > { %407 = vst [vmem:[%s813_s8 + $0x80] sm:$0xff] %v343_v38 }
  0xa0   : > { %415 = vst [vmem:[%s813_s8 + $0xc0] sm:$0xff] %v367_v39 }
  0xa2   : > { %v298_v40 = vpop.f32.mrf.mxu0  ;;  %v322_v41 = vpop.f32.mrf.mxu1 }
  0xa3   : > { %392 = vst [vmem:[%s813_s8 + $0x8] sm:$0xff] %v298_v40 }
  0xa4   : > { %400 = vst [vmem:[%s813_s8 + $0x48] sm:$0xff] %v322_v41 }
  0xa6   : > { %v346_v42 = vpop.f32.mrf.mxu2  ;;  %v370_v43 = vpop.f32.mrf.mxu3 }
  0xa7   : > { %408 = vst [vmem:[%s813_s8 + $0x88] sm:$0xff] %v346_v42 }
  0xa8   : > { %416 = vst [vmem:[%s813_s8 + $0xc8] sm:$0xff] %v370_v43 }
  0xaa   : > { %v301_v44 = vpop.f32.mrf.mxu0  ;;  %v325_v45 = vpop.f32.mrf.mxu1 }
  0xab   : > { %393 = vst [vmem:[%s813_s8 + $0x10] sm:$0xff] %v301_v44 }
  0xac   : > { %401 = vst [vmem:[%s813_s8 + $0x50] sm:$0xff] %v325_v45 }
  0xae   : > { %v349_v46 = vpop.f32.mrf.mxu2  ;;  %v373_v47 = vpop.f32.mrf.mxu3 }
  0xaf   : > { %409 = vst [vmem:[%s813_s8 + $0x90] sm:$0xff] %v349_v46 }
  0xb0   : > { %417 = vst [vmem:[%s813_s8 + $0xd0] sm:$0xff] %v373_v47 }
  0xb2   : > { %v304_v48 = vpop.f32.mrf.mxu0  ;;  %v328_v49 = vpop.f32.mrf.mxu1 }
  0xb3   : > { %394 = vst [vmem:[%s813_s8 + $0x18] sm:$0xff] %v304_v48 }
  0xb4   : > { %402 = vst [vmem:[%s813_s8 + $0x58] sm:$0xff] %v328_v49 }
  0xb6   : > { %v352_v50 = vpop.f32.mrf.mxu2  ;;  %v376_v51 = vpop.f32.mrf.mxu3 }
  0xb7   : > { %410 = vst [vmem:[%s813_s8 + $0x98] sm:$0xff] %v352_v50 }
  0xb8   : > { %418 = vst [vmem:[%s813_s8 + $0xd8] sm:$0xff] %v376_v51 }
  0xba   : > { %v307_v52 = vpop.f32.mrf.mxu0  ;;  %v331_v53 = vpop.f32.mrf.mxu1 }
  0xbb   : > { %395 = vst [vmem:[%s813_s8 + $0x20] sm:$0xff] %v307_v52 }
  0xbc   : > { %403 = vst [vmem:[%s813_s8 + $0x60] sm:$0xff] %v331_v53 }
  0xbe   : > { %v355_v54 = vpop.f32.mrf.mxu2  ;;  %v379_v55 = vpop.f32.mrf.mxu3 }
  0xbf   : > { %411 = vst [vmem:[%s813_s8 + $0xa0] sm:$0xff] %v355_v54 }
  0xc0   : > { %419 = vst [vmem:[%s813_s8 + $0xe0] sm:$0xff] %v379_v55 }
  0xc2   : > { %v310_v56 = vpop.f32.mrf.mxu0  ;;  %v334_v57 = vpop.f32.mrf.mxu1 }
  0xc3   : > { %396 = vst [vmem:[%s813_s8 + $0x28] sm:$0xff] %v310_v56 }
  0xc4   : > { %404 = vst [vmem:[%s813_s8 + $0x68] sm:$0xff] %v334_v57 }
  0xc6   : > { %v358_v58 = vpop.f32.mrf.mxu2  ;;  %v382_v59 = vpop.f32.mrf.mxu3 }
  0xc7   : > { %412 = vst [vmem:[%s813_s8 + $0xa8] sm:$0xff] %v358_v58 }
  0xc8   : > { %420 = vst [vmem:[%s813_s8 + $0xe8] sm:$0xff] %v382_v59 }
  0xca   : > { %v313_v60 = vpop.f32.mrf.mxu0  ;;  %v337_v61 = vpop.f32.mrf.mxu1 }
  0xcb   : > { %397 = vst [vmem:[%s813_s8 + $0x30] sm:$0xff] %v313_v60 }
  0xcc   : > { %405 = vst [vmem:[%s813_s8 + $0x70] sm:$0xff] %v337_v61 }
  0xce   : > { %v361_v62 = vpop.f32.mrf.mxu2  ;;  %v385_v63 = vpop.f32.mrf.mxu3 }
  0xcf   : > { %413 = vst [vmem:[%s813_s8 + $0xb0] sm:$0xff] %v361_v62 }
  0xd0   : > { %421 = vst [vmem:[%s813_s8 + $0xf0] sm:$0xff] %v385_v63 }
  0xd2   : > { %v316_v0 = vpop.f32.mrf.mxu0  ;;  %v340_v1 = vpop.f32.mrf.mxu1 }
  0xd3   : > { %398 = vst [vmem:[%s813_s8 + $0x38] sm:$0xff] %v316_v0 }
  0xd4   : > { %406 = vst [vmem:[%s813_s8 + $0x78] sm:$0xff] %v340_v1 }
  0xd6   : > { %v364_v2 = vpop.f32.mrf.mxu2  ;;  %v388_v3 = vpop.f32.mrf.mxu3 }
  0xd7   : > { %414 = vst [vmem:[%s813_s8 + $0xb8] sm:$0xff] %v364_v2 }
  0xd8   : > { %422 = vst [vmem:[%s813_s8 + $0xf8] sm:$0xff] %v388_v3 }
  0xd9   : > { %626 = shalt.err (!%p623_p3)
}
  0xda   : > { %s663_s3 = smov 128   ;;  %s664_s4 = smov 8  }
  0xdb   : > { %558 = dma.vmem_to_hbm [thread:$0]  (%p718_p5), %s437_s22, 4096, %s439_s23, %s424_s13, %s663_s3, %s663_s3, %s664_s4  }
  0xdc PF: > { %p564_p4 = scmp.ge.s32.totalorder %s661_s12, 2  ;;  %s453_s5 = sand.u32 1, %s649_s9  }
  0xdd   : > { %s454_s6 = scalar_lea.sflag [#allocation3], %s453_s5 }
  0xde   : > { %p561_p7 = pnand %p564_p4, %p722_p6 }
  0xe0   : > { %p562_p8 = pneg %p561_p7 }
  0xe2   : > { %644 = dma.done.wait (%p562_p8), %s454_s6, 4096  }
  0xe3   : > { %646 = vsyncadd (%p562_p8), %s454_s6, 4294963200  ;;  %p12_p9 = scmp.ge.s32.totalorder %s705_s15, 4   ;;  %s886_s9 = smov %s653_s10 }
  0xe4   : > { %s887_s10 = smov %s657_s11  ;;  %s888_s11 = smov %s716_s18 }
  0xe5   : > { %s889_s12 = smov %s705_s15  ;;  %14 = sbr.rel (!%p12_p9) target bundleno = 3 (0x3), region = 63 }
  0xea   :  { %460 = vsyncpa [#allocation3], 1 }
  0xeb   :  { %462 = vsyncpa [#allocation3 + $0x1], 1 }

</bundles_post_ra>
